<compile_context>
chip_gen: v6e
topology: v6e:2x2x1
jax: 0.10.0
libtpu: 0.0.40
codegen_flags: <defaults>
</compile_context>

<pallas_src>
import functools

import jax
import jax.numpy as jnp
from jax.experimental import pallas as pl
from jax.experimental.pallas import tpu as pltpu


def autoencoder_kernel(x_ref,
                       w1_ref, b1_ref,
                       w23_ref, b23_ref,
                       w4_ref, b4_ref,
                       o_ref):
    """One batch tile in natural (batch, features) layout: x/o are (TB, 40)."""
    x = x_ref[...]                                                      # (TB, 40) f32

    # encoder Linear(40->20) + ReLU            h = x @ W1^T + b1
    h = jnp.dot(x, w1_ref[...], preferred_element_type=jnp.float32) + b1_ref[...]
    h = jnp.maximum(h, 0.0)

    # fused [encoder Linear(20->10) ; decoder Linear(10->20)] + decoder ReLU
    h = jnp.dot(h, w23_ref[...], preferred_element_type=jnp.float32) + b23_ref[...]
    h = jnp.maximum(h, 0.0)

    # decoder Linear(20->40)
    y = jnp.dot(h, w4_ref[...], preferred_element_type=jnp.float32) + b4_ref[...]

    o_ref[...] = y.astype(o_ref.dtype)


def linear_autoencoder(x, params, *, tb=1024):
    """x: (B, 40) float32 (PyTorch row layout).
    params: 4 tuples of PyTorch-layout (W (out,in), b (out,)).
    tb: rows per grid step.  Bigger tiles amortize the ~0.35us/step pipeline
        overhead; 1024-4096 is a good range on v5e/v6e/v7x.
    """
    B, D = x.shape
    assert D == 40, "MyLinearAutoencoder expects 40 input features"

    (w1, b1), (w2, b2), (w3, b3), (w4, b4) = params
    f32 = jnp.float32

    # Pre-fuse the activation-free middle pair Linear(20->10) -> Linear(10->20):
    #   W3 @ (W2 @ h + b2) + b3 = (W3 @ W2) @ h + (W3 @ b2 + b3)
    w23 = w3.astype(f32) @ w2.astype(f32)                       # (20, 20)
    b23 = w3.astype(f32) @ b2.astype(f32) + b3.astype(f32)      # (20,)

    # Kernel computes x @ W, so store weights as (in, out); biases as (1, out).
    w1t = w1.astype(f32).T        # (40, 20)
    w23t = w23.T                  # (20, 20)
    w4t = w4.astype(f32).T        # (20, 40)
    row = lambda b: b.astype(f32).reshape(1, -1)

    xin = x.astype(f32)
    if B <= tb:
        tb_eff, b_pad = B, B      # single full-extent block (always a legal block shape)
    else:
        tb_eff = tb
        b_pad = ((B + tb - 1) // tb) * tb
        if b_pad != B:
            xin = jnp.pad(xin, ((0, b_pad - B), (0, 0)))

    grid = (b_pad // tb_eff,)
    const = lambda i: (0, 0)      # weights/biases stay VMEM-resident across the grid
    xmap = lambda i: (i, 0)

    flops = 2 * b_pad * (40 * 20 + 20 * 20 + 20 * 40)
    bytes_accessed = 4 * (2 * b_pad * 40 + w1t.size + w23t.size + w4t.size + 80)

    out = pl.pallas_call(
        autoencoder_kernel,
        out_shape=jax.ShapeDtypeStruct((b_pad, 40), x.dtype),
        grid=grid,
        in_specs=[
            pl.BlockSpec((tb_eff, 40), xmap),                              # x tile
            pl.BlockSpec((40, 20), const), pl.BlockSpec((1, 20), const),   # W1^T, b1
            pl.BlockSpec((20, 20), const), pl.BlockSpec((1, 20), const),   # W23^T, b23
            pl.BlockSpec((20, 40), const), pl.BlockSpec((1, 40), const),   # W4^T, b4
        ],
        out_specs=pl.BlockSpec((tb_eff, 40), xmap),
        compiler_params=pltpu.CompilerParams(
            dimension_semantics=("parallel",),   # megacore-shard batch on v7x
        ),
        cost_estimate=pl.CostEstimate(
            flops=flops, transcendentals=0, bytes_accessed=bytes_accessed),
    )(xin, w1t, row(b1), w23t, row(b23), w4t, row(b4))

    return out[:B] if b_pad != B else out


def init_params(key):
    """PyTorch-style Linear init: W (out,in), b (out,), U(-1/sqrt(fan_in), 1/sqrt(fan_in))."""
    layer_dims = [(40, 20), (20, 10), (10, 20), (20, 40)]  # (in, out)
    params = []
    for din, dout in layer_dims:
        key, kw, kb = jax.random.split(key, 3)
        bound = 1.0 / float(din) ** 0.5
        w = jax.random.uniform(kw, (dout, din), jnp.float32, -bound, bound)
        b = jax.random.uniform(kb, (dout,), jnp.float32, -bound, bound)
        params.append((w, b))
    return params


def reference_forward(x, params):
    """Pure-JAX reference mirroring the PyTorch Sequential (unfused)."""
    (w1, b1), (w2, b2), (w3, b3), (w4, b4) = params
    h = jnp.maximum(x @ w1.T + b1, 0.0)   # enc Linear(40->20) + ReLU
    h = h @ w2.T + b2                     # enc Linear(20->10)
    h = jnp.maximum(h @ w3.T + b3, 0.0)   # dec Linear(10->20) + ReLU
    return h @ w4.T + b4                  # dec Linear(20->40)


if __name__ == "__main__":
    key = jax.random.PRNGKey(0)
    key, kx = jax.random.split(key)

    batch = 200  # non-multiple of the tile: exercises padding + a 2-step grid
    x = jax.random.normal(kx, (batch, 40), jnp.float32)
    params = init_params(key)

    fwd = jax.jit(functools.partial(linear_autoencoder, tb=128))
    out = jax.block_until_ready(fwd(x, params))

    ref = reference_forward(x, params)
    assert out.shape == (batch, 40)
    assert jnp.allclose(out, ref, atol=1e-4, rtol=1e-4), (
        float(jnp.max(jnp.abs(out - ref))))

    print("KERNEL_OK")
</pallas_src>

<mosaic_0001>
module attributes {stable_mosaic.version = 11 : i64} {
  func.func @autoencoder_kernel(%arg0: i32, %arg1: memref<128x40xf32, #tpu.memory_space<vmem>>, %arg2: memref<40x20xf32, #tpu.memory_space<vmem>>, %arg3: memref<1x20xf32, #tpu.memory_space<vmem>>, %arg4: memref<20x20xf32, #tpu.memory_space<vmem>>, %arg5: memref<1x20xf32, #tpu.memory_space<vmem>>, %arg6: memref<20x40xf32, #tpu.memory_space<vmem>>, %arg7: memref<1x40xf32, #tpu.memory_space<vmem>>, %arg8: memref<128x40xf32, #tpu.memory_space<vmem>>) attributes {dimension_semantics = [#tpu.dimension_semantics<parallel>], iteration_bounds = array<i64: 2>, scalar_prefetch = 0 : i64, scratch_operands = 0 : i64, tpu.core_type = #tpu.core_type<tc>, window_params = [{transform_indices = @transform_0, window_bounds = array<i64: 128, 40>}, {pipeline_mode = #tpu.pipeline_mode<synchronous>, transform_indices = @transform_1, window_bounds = array<i64: 40, 20>}, {pipeline_mode = #tpu.pipeline_mode<synchronous>, transform_indices = @transform_2, window_bounds = array<i64: 1, 20>}, {pipeline_mode = #tpu.pipeline_mode<synchronous>, transform_indices = @transform_3, window_bounds = array<i64: 20, 20>}, {pipeline_mode = #tpu.pipeline_mode<synchronous>, transform_indices = @transform_4, window_bounds = array<i64: 1, 20>}, {pipeline_mode = #tpu.pipeline_mode<synchronous>, transform_indices = @transform_5, window_bounds = array<i64: 20, 40>}, {pipeline_mode = #tpu.pipeline_mode<synchronous>, transform_indices = @transform_6, window_bounds = array<i64: 1, 40>}, {transform_indices = @transform_7, window_bounds = array<i64: 128, 40>}]} {
    %c0 = arith.constant 0 : index
    %c0_0 = arith.constant 0 : index
    %0 = vector.load %arg1[%c0, %c0_0] : memref<128x40xf32, #tpu.memory_space<vmem>>, vector<128x40xf32>
    %c0_1 = arith.constant 0 : index
    %c0_2 = arith.constant 0 : index
    %1 = vector.load %arg2[%c0_1, %c0_2] : memref<40x20xf32, #tpu.memory_space<vmem>>, vector<40x20xf32>
    %cst = arith.constant dense<0.000000e+00> : vector<128x20xf32>
    %2 = tpu.matmul %0, %1, %cst {dimension_numbers = #tpu.dot_dimension_numbers<[1], [0], [0], [1], [0, 0, 1, 1], [], []>} : vector<128x40xf32>, vector<40x20xf32>, vector<128x20xf32> -> vector<128x20xf32>
    %c0_3 = arith.constant 0 : index
    %c0_4 = arith.constant 0 : index
    %3 = vector.load %arg3[%c0_3, %c0_4] : memref<1x20xf32, #tpu.memory_space<vmem>>, vector<1x20xf32>
    %4 = vector.broadcast %3 : vector<1x20xf32> to vector<128x20xf32>
    %5 = arith.addf %2, %4 : vector<128x20xf32>
    %cst_5 = arith.constant 0.000000e+00 : f32
    %6 = vector.broadcast %cst_5 : f32 to vector<128x20xf32>
    %7 = arith.maximumf %5, %6 : vector<128x20xf32>
    %c0_6 = arith.constant 0 : index
    %c0_7 = arith.constant 0 : index
    %8 = vector.load %arg4[%c0_6, %c0_7] : memref<20x20xf32, #tpu.memory_space<vmem>>, vector<20x20xf32>
    %cst_8 = arith.constant dense<0.000000e+00> : vector<128x20xf32>
    %9 = tpu.matmul %7, %8, %cst_8 {dimension_numbers = #tpu.dot_dimension_numbers<[1], [0], [0], [1], [0, 0, 1, 1], [], []>} : vector<128x20xf32>, vector<20x20xf32>, vector<128x20xf32> -> vector<128x20xf32>
    %c0_9 = arith.constant 0 : index
    %c0_10 = arith.constant 0 : index
    %10 = vector.load %arg5[%c0_9, %c0_10] : memref<1x20xf32, #tpu.memory_space<vmem>>, vector<1x20xf32>
    %11 = vector.broadcast %10 : vector<1x20xf32> to vector<128x20xf32>
    %12 = arith.addf %9, %11 : vector<128x20xf32>
    %cst_11 = arith.constant 0.000000e+00 : f32
    %13 = vector.broadcast %cst_11 : f32 to vector<128x20xf32>
    %14 = arith.maximumf %12, %13 : vector<128x20xf32>
    %c0_12 = arith.constant 0 : index
    %c0_13 = arith.constant 0 : index
    %15 = vector.load %arg6[%c0_12, %c0_13] : memref<20x40xf32, #tpu.memory_space<vmem>>, vector<20x40xf32>
    %cst_14 = arith.constant dense<0.000000e+00> : vector<128x40xf32>
    %16 = tpu.matmul %14, %15, %cst_14 {dimension_numbers = #tpu.dot_dimension_numbers<[1], [0], [0], [1], [0, 0, 1, 1], [], []>} : vector<128x20xf32>, vector<20x40xf32>, vector<128x40xf32> -> vector<128x40xf32>
    %c0_15 = arith.constant 0 : index
    %c0_16 = arith.constant 0 : index
    %17 = vector.load %arg7[%c0_15, %c0_16] : memref<1x40xf32, #tpu.memory_space<vmem>>, vector<1x40xf32>
    %18 = vector.broadcast %17 : vector<1x40xf32> to vector<128x40xf32>
    %19 = arith.addf %16, %18 : vector<128x40xf32>
    %c0_17 = arith.constant 0 : index
    %c0_18 = arith.constant 0 : index
    %20 = vector.load %arg8[%c0_17, %c0_18] : memref<128x40xf32, #tpu.memory_space<vmem>>, vector<128x40xf32>
    tpu.vector_store %arg8[%c0_17, %c0_18], %19 {strides = array<i32>} : memref<128x40xf32, #tpu.memory_space<vmem>>, vector<128x40xf32>,
    return
  }
  func.func @transform_0(%arg0: i32) -> (i32, i32) {
    %c0_i32 = arith.constant 0 : i32
    %c0_i32_0 = arith.constant 0 : i32
    return %arg0, %c0_i32 : i32, i32
  }
  func.func @transform_1(%arg0: i32) -> (i32, i32) {
    %c0_i32 = arith.constant 0 : i32
    %c0_i32_0 = arith.constant 0 : i32
    %c0_i32_1 = arith.constant 0 : i32
    return %c0_i32, %c0_i32_0 : i32, i32
  }
  func.func @transform_2(%arg0: i32) -> (i32, i32) {
    %c0_i32 = arith.constant 0 : i32
    %c0_i32_0 = arith.constant 0 : i32
    %c0_i32_1 = arith.constant 0 : i32
    return %c0_i32, %c0_i32_0 : i32, i32
  }
  func.func @transform_3(%arg0: i32) -> (i32, i32) {
    %c0_i32 = arith.constant 0 : i32
    %c0_i32_0 = arith.constant 0 : i32
    %c0_i32_1 = arith.constant 0 : i32
    return %c0_i32, %c0_i32_0 : i32, i32
  }
  func.func @transform_4(%arg0: i32) -> (i32, i32) {
    %c0_i32 = arith.constant 0 : i32
    %c0_i32_0 = arith.constant 0 : i32
    %c0_i32_1 = arith.constant 0 : i32
    return %c0_i32, %c0_i32_0 : i32, i32
  }
  func.func @transform_5(%arg0: i32) -> (i32, i32) {
    %c0_i32 = arith.constant 0 : i32
    %c0_i32_0 = arith.constant 0 : i32
    %c0_i32_1 = arith.constant 0 : i32
    return %c0_i32, %c0_i32_0 : i32, i32
  }
  func.func @transform_6(%arg0: i32) -> (i32, i32) {
    %c0_i32 = arith.constant 0 : i32
    %c0_i32_0 = arith.constant 0 : i32
    %c0_i32_1 = arith.constant 0 : i32
    return %c0_i32, %c0_i32_0 : i32, i32
  }
  func.func @transform_7(%arg0: i32) -> (i32, i32) {
    %c0_i32 = arith.constant 0 : i32
    %c0_i32_0 = arith.constant 0 : i32
    return %arg0, %c0_i32 : i32, i32
  }
}

</mosaic_0001>

<bundles_post_ra>
// kernel: linear_autoencoder.1
= control target key start
LH: loop header
LB: loop body
LE: loop exit
PB: predicated region body
PF: predicated region fallthrough
CT: control target
= control target key end

     0   :  { %s1301_s24 = smov 0   ;;  %s1491_s0 = inlined_call_operand.vmem [shape: f32[256,40], index: 0, kind: input, shape index: {}]   ;;  %s1492_s1 = inlined_call_operand.vmem [shape: f32[40,20], index: 1, kind: input, shape index: {}]   ;;  %s1493_s2 = inlined_call_operand.vmem [shape: f32[1,20], index: 2, kind: input, shape index: {}]   ;;  %s1494_s3 = inlined_call_operand.vmem [shape: f32[20,20], index: 3, kind: input, shape index: {}]   ;;  %s1495_s4 = inlined_call_operand.vmem [shape: f32[1,20], index: 4, kind: input, shape index: {}]   ;;  %s1496_s5 = inlined_call_operand.vmem [shape: f32[20,40], index: 5, kind: input, shape index: {}]   ;;  %s1497_s6 = inlined_call_operand.vmem [shape: f32[1,40], index: 6, kind: input, shape index: {}]   ;;  %s1498_s7 = inlined_call_operand.vmem [shape: f32[256,40], index: 7, kind: output, shape index: {}]  }
   0x1 LB: > { %s1022_s25 = sadd.s32 4294967295, %s1259_s24   ;;  %p1026_p0 = scmp.ge.s32.totalorder %s1259_s24, 1  ;;  %s1259_s24 = sphi %s1301_s24, %s17_s24  }
   0x2   : > { %p238_p1 = scmp.lt.s32.totalorder %s1259_s24, 3 }
   0x4   : > { %p239_p2 = pnand %p1026_p0, %p238_p1 }
   0x5   : > { %s1027_s30 = sshll.u32 (!%p239_p2), %s1022_s25, 4 }
   0x6   : > { %242 = sbr.rel (%p239_p2) target bundleno = 648 (0x288), region = 48  ;;  %p271_p3 = scmp.lt.s32.totalorder (!%p239_p2), %s1027_s30, 31 }
   0xb   : > { %v302_v0 = vld [vmem:[%s1492_s1 + $0x20] sm:$0xff]  ;;  %v301_v1 = vld [vmem:[%s1492_s1 + $0x18] sm:$0xff]  ;;  %v522_v2 = vld [vmem:[%s1494_s3 + $0x10] sm:$0xf]  ;;  %vm579_vm0 = vcmask 1043456   ;;  %s1500_s30 = smov (!%p271_p3, %s1027_s30), 31 }
   0xc   : > { %1145 = vmatprep.subr.mxu0 %v302_v0  ;;  %v300_v3 = vld [vmem:[%s1492_s1 + $0x10] sm:$0xff]  ;;  %1239 = vmatprep.subr.msk.mxu1 %vm579_vm0, %v522_v2  ;;  %v521_v4 = vld [vmem:[%s1494_s3 + $0x8] sm:$0xff]  ;;  %s1028_s16 = sshll.u32 %s1500_s30, 3  ;;  %vm310_vm1 = vcmask 326656   ;;  %v520_v6 = vld [vmem:[%s1494_s3] sm:$0xff]  ;;  %vm530_vm2 = vcmask 162816  }
   0xd   : > { %1146 = vmatpush3.msra.mxu0 %v302_v0  ;;  %1242 = vmatpush3.msk.msra.mxu1 %vm579_vm0, %v522_v2  ;;  %v299_v5 = vld [vmem:[%s1492_s1 + $0x8] sm:$0xff]  ;;  %v298_v7 = vld [vmem:[%s1492_s1] sm:$0xff]  ;;  %s1343_s23 = scalar_lea.vmem %s1491_s0, %s1028_s16  ;;  %v746_v24 = vld [vmem:[%s1496_s5 + $0x10] sm:$0xf]  ;;  %s1454_s18 = scalar_lea.vmem %s1498_s7, %s1028_s16 }
   0xe   : > { %1147 = vmatprep.subr.mxu0 %v301_v1  ;;  %1240 = vmatprep.subr.mxu1 %v521_v4  ;;  %v282_v8 = vld [vmem:[%s1343_s23] sm:$0xff]  ;;  %v283_v9 = vld [vmem:[%s1343_s23 + $0x8] sm:$0xff]  ;;  %v284_v10 = vld [vmem:[%s1343_s23 + $0x10] sm:$0xff] }
   0xf   : > { %1148 = vmatpush3.msra.mxu0 %v301_v1  ;;  %1243 = vmatpush3.msra.mxu1 %v521_v4  ;;  %v285_v11 = vld [vmem:[%s1343_s23 + $0x18] sm:$0xff]  ;;  %v286_v12 = vld [vmem:[%s1343_s23 + $0x20] sm:$0xff]  ;;  %v287_v13 = vld [vmem:[%s1343_s23 + $0x28] sm:$0xff] }
  0x10   : > { %1149 = vmatprep.subr.mxu0 %v300_v3  ;;  %1241 = vmatprep.subr.mxu1 %v520_v6  ;;  %v288_v14 = vld [vmem:[%s1343_s23 + $0x30] sm:$0xff]  ;;  %v289_v15 = vld [vmem:[%s1343_s23 + $0x38] sm:$0xff]  ;;  %v290_v16 = vld [vmem:[%s1343_s23 + $0x40] sm:$0xff] }
  0x11   : > { %1150 = vmatpush3.msra.mxu0 %v300_v3  ;;  %1244 = vmatpush3.msra.mxu1 %v520_v6  ;;  %v291_v17 = vld [vmem:[%s1343_s23 + $0x48] sm:$0xff]  ;;  %v292_v18 = vld [vmem:[%s1343_s23 + $0x50] sm:$0xff]  ;;  %v293_v19 = vld [vmem:[%s1343_s23 + $0x58] sm:$0xff] }
  0x12   : > { %1151 = vmatprep.subr.mxu0 %v299_v5  ;;  %1155 = vmatprep.mubr.msk.f32.mxu0 %vm310_vm1, %v282_v8  ;;  %v294_v20 = vld [vmem:[%s1343_s23 + $0x60] sm:$0xff]  ;;  %v295_v21 = vld [vmem:[%s1343_s23 + $0x68] sm:$0xff]  ;;  %v296_v22 = vld [vmem:[%s1343_s23 + $0x70] sm:$0xff] }
  0x13   : > { %1152 = vmatpush3.msra.mxu0 %v299_v5  ;;  %v297_v23 = vld [vmem:[%s1343_s23 + $0x78] sm:$0xff]  ;;  %1209 = vmatprep.subr.msk.mxu1 %vm579_vm0, %v746_v24  ;;  %v1386_v25 = vld [vmem:[%s1493_s2] ss:$0 sm:$0xff]  ;;  %v745_v54 = vld [vmem:[%s1496_s5 + $0x8] sm:$0xff] }
  0x14   : > { %1153 = vmatprep.subr.mxu0 %v298_v7 }
  0x15   : > { %1154 = vmatpush3.msra.mxu0 %v298_v7 }
  0x16   : > { %1156 = vmatmul.mubr.msk.f32.vlgmr.msra.gmra.mxu0 %vm310_vm1, %v283_v9  ;;  %1179 = vmatprep.subr.msk.mxu0 %vm579_vm0, %v522_v2 }
  0x17   : > { %1158 = vmatprep.mubr.msk.f32.mxu0 %vm310_vm1, %v284_v10  ;;  %1180 = vmatpush3.msk.msra.mxu0 %vm579_vm0, %v522_v2 }
  0x18   : > { %1181 = vmatprep.subr.mxu0 %v521_v4 }
  0x19   : > { %1182 = vmatpush3.msra.mxu0 %v521_v4 }
  0x1a   : > { %1159 = vmatmul.mubr.msk.f32.gmra.mxu0 %vm310_vm1, %v285_v11  ;;  %1183 = vmatprep.subr.mxu0 %v520_v6  ;;  %v744_v11 = vld [vmem:[%s1496_s5] sm:$0xff] }
  0x1b   : > { %1161 = vmatprep.mubr.msk.f32.mxu0 %vm310_vm1, %v286_v12  ;;  %1184 = vmatpush3.msra.mxu0 %v520_v6  ;;  %v1048_v12 = vld [vmem:[%s1495_s4] ss:$0 sm:$0xff] }
  0x1e   : > { %1162 = vmatmul.mubr.msk.f32.gmra.mxu0 %vm310_vm1, %v287_v13 }
  0x1f   : > { %1164 = vmatprep.mubr.msk.f32.mxu0 %vm310_vm1, %v288_v14 }
  0x22   : > { %1165 = vmatmul.mubr.msk.f32.gmra.mxu0 %vm310_vm1, %v289_v15 }
  0x23   : > { %1167 = vmatprep.mubr.msk.f32.mxu0 %vm310_vm1, %v290_v16 }
  0x26   : > { %1168 = vmatmul.mubr.msk.f32.gmra.mxu0 %vm310_vm1, %v291_v17 }
  0x27   : > { %1170 = vmatprep.mubr.msk.f32.mxu0 %vm310_vm1, %v292_v18 }
  0x2a   : > { %1171 = vmatmul.mubr.msk.f32.gmra.mxu0 %vm310_vm1, %v293_v19 }
  0x2b   : > { %1173 = vmatprep.mubr.msk.f32.mxu0 %vm310_vm1, %v294_v20 }
  0x2e   : > { %1174 = vmatmul.mubr.msk.f32.gmra.mxu0 %vm310_vm1, %v295_v21 }
  0x2f   : > { %1176 = vmatprep.mubr.msk.f32.mxu0 %vm310_vm1, %v296_v22 }
  0x32   : > { %1177 = vmatmul.mubr.msk.f32.gmra.mxu0 %vm310_vm1, %v297_v23 }
  0xd6   : > { %v1157_v26 = vpop.f32.mrf.mxu0 }
  0xd7   : > { %v431_v27 = vadd.f32 %v1157_v26, %v1386_v25 }
  0xd8   : > { %v425_v28 = vpop.f32.mrf.mxu0 }
  0xd9   : > { %v426_v29 = vadd.f32 %v1386_v25, %v425_v28  ;;  %v505_v32 = vmax.f32 %v431_v27, 0.0 }
  0xda   : > { %v1160_v30 = vpop.f32.mrf.mxu0 }
  0xdb   : > { %v504_v31 = vmax.f32 %v426_v29, 0.0  ;;  %v441_v33 = vadd.f32 %v1160_v30, %v1386_v25 }
  0xdc   : > { %v435_v34 = vpop.f32.mrf.mxu0 }
  0xdd   : > { %v436_v35 = vadd.f32 %v1386_v25, %v435_v34  ;;  %1185 = vmatprep.mubr.msk.f32.mxu0 %vm530_vm2, %v504_v31  ;;  %v507_v38 = vmax.f32 %v441_v33, 0.0 }
  0xde   : > { %v1163_v36 = vpop.f32.mrf.mxu0  ;;  %1186 = vmatmul.mubr.msk.f32.vlgmr.msra.gmra.mxu0 %vm530_vm2, %v505_v32 }
  0xdf   : > { %v506_v37 = vmax.f32 %v436_v35, 0.0  ;;  %v451_v39 = vadd.f32 %v1163_v36, %v1386_v25 }
  0xe0   : > { %v445_v40 = vpop.f32.mrf.mxu0 }
  0xe1   : > { %v446_v41 = vadd.f32 %v1386_v25, %v445_v40  ;;  %1188 = vmatprep.mubr.msk.f32.mxu0 %vm530_vm2, %v506_v37  ;;  %v509_v44 = vmax.f32 %v451_v39, 0.0 }
  0xe2   : > { %v1166_v42 = vpop.f32.mrf.mxu0  ;;  %1189 = vmatmul.mubr.msk.f32.gmra.mxu0 %vm530_vm2, %v507_v38 }
  0xe3   : > { %v508_v43 = vmax.f32 %v446_v41, 0.0  ;;  %v461_v45 = vadd.f32 %v1166_v42, %v1386_v25 }
  0xe4   : > { %v455_v46 = vpop.f32.mrf.mxu0 }
  0xe5   : > { %v456_v47 = vadd.f32 %v1386_v25, %v455_v46  ;;  %1191 = vmatprep.mubr.msk.f32.mxu0 %vm530_vm2, %v508_v43  ;;  %v511_v50 = vmax.f32 %v461_v45, 0.0 }
  0xe6   : > { %v1169_v48 = vpop.f32.mrf.mxu0  ;;  %1192 = vmatmul.mubr.msk.f32.gmra.mxu0 %vm530_vm2, %v509_v44 }
  0xe7   : > { %v510_v49 = vmax.f32 %v456_v47, 0.0  ;;  %v471_v51 = vadd.f32 %v1169_v48, %v1386_v25 }
  0xe8   : > { %v465_v52 = vpop.f32.mrf.mxu0 }
  0xe9   : > { %v466_v53 = vadd.f32 %v1386_v25, %v465_v52  ;;  %1194 = vmatprep.mubr.msk.f32.mxu1 %vm530_vm2, %v510_v49  ;;  %v513_v57 = vmax.f32 %v471_v51, 0.0 }
  0xea   : > { %v1172_v55 = vpop.f32.mrf.mxu0  ;;  %1195 = vmatmul.mubr.msk.f32.vlgmr.msra.gmra.mxu1 %vm530_vm2, %v511_v50 }
  0xeb   : > { %v512_v56 = vmax.f32 %v466_v53, 0.0  ;;  %1210 = vmatpush3.msk.msra.mxu1 %vm579_vm0, %v746_v24  ;;  %v481_v58 = vadd.f32 %v1172_v55, %v1386_v25 }
  0xec   : > { %v475_v59 = vpop.f32.mrf.mxu0  ;;  %1211 = vmatprep.subr.mxu1 %v745_v54 }
  0xed   : > { %v476_v60 = vadd.f32 %v1386_v25, %v475_v59  ;;  %1197 = vmatprep.mubr.msk.f32.mxu1 %vm530_vm2, %v512_v56  ;;  %1212 = vmatpush3.msra.mxu1 %v745_v54  ;;  %v515_v63 = vmax.f32 %v481_v58, 0.0 }
  0xee   : > { %v1175_v61 = vpop.f32.mrf.mxu0  ;;  %1198 = vmatmul.mubr.msk.f32.gmra.mxu1 %vm530_vm2, %v513_v57  ;;  %1213 = vmatprep.subr.mxu1 %v744_v11 }
  0xef   : > { %v514_v62 = vmax.f32 %v476_v60, 0.0  ;;  %v491_v0 = vadd.f32 %v1175_v61, %v1386_v25  ;;  %1214 = vmatpush3.msra.mxu1 %v744_v11  ;;  %v1066_v61 = vld [vmem:[%s1497_s6] ss:$0 sm:$0xff] }
  0xf0   : > { %v485_v1 = vpop.f32.mrf.mxu0 }
  0xf1   : > { %v486_v2 = vadd.f32 %v1386_v25, %v485_v1  ;;  %1200 = vmatprep.mubr.msk.f32.mxu1 %vm530_vm2, %v514_v62  ;;  %v517_v5 = vmax.f32 %v491_v0, 0.0 }
  0xf2   : > { %v1178_v3 = vpop.f32.mrf.mxu0  ;;  %1201 = vmatmul.mubr.msk.f32.gmra.mxu1 %vm530_vm2, %v515_v63 }
  0xf3   : > { %v516_v4 = vmax.f32 %v486_v2, 0.0  ;;  %v501_v6 = vadd.f32 %v1178_v3, %v1386_v25 }
  0xf4   : > { %v495_v7 = vpop.f32.mrf.mxu0 }
  0xf5   : > { %v496_v8 = vadd.f32 %v1386_v25, %v495_v7  ;;  %1203 = vmatprep.mubr.msk.f32.mxu1 %vm530_vm2, %v516_v4  ;;  %v519_v10 = vmax.f32 %v501_v6, 0.0 }
  0xf6   : > { %1204 = vmatmul.mubr.msk.f32.gmra.mxu1 %vm530_vm2, %v517_v5 }
  0xf7   : > { %v518_v9 = vmax.f32 %v496_v8, 0.0 }
  0xf9   : > { %1206 = vmatprep.mubr.msk.f32.mxu1 %vm530_vm2, %v518_v9 }
  0xfa   : > { %1207 = vmatmul.mubr.msk.f32.gmra.mxu1 %vm530_vm2, %v519_v10 }
 0x19e   : > { %v1187_v13 = vpop.f32.mrf.mxu0 }
 0x19f   : > { %v655_v14 = vadd.f32 %v1187_v13, %v1048_v12 }
 0x1a0   : > { %v649_v15 = vpop.f32.mrf.mxu0 }
 0x1a1   : > { %v650_v16 = vadd.f32 %v1048_v12, %v649_v15  ;;  %v729_v19 = vmax.f32 %v655_v14, 0.0 }
 0x1a2   : > { %v1190_v17 = vpop.f32.mrf.mxu0 }
 0x1a3   : > { %v728_v18 = vmax.f32 %v650_v16, 0.0  ;;  %v665_v20 = vadd.f32 %v1190_v17, %v1048_v12 }
 0x1a4   : > { %v659_v21 = vpop.f32.mrf.mxu0 }
 0x1a5   : > { %v660_v22 = vadd.f32 %v1048_v12, %v659_v21  ;;  %1215 = vmatprep.mubr.msk.f32.mxu1 %vm530_vm2, %v728_v18  ;;  %v731_v25 = vmax.f32 %v665_v20, 0.0 }
 0x1a6   : > { %v1193_v23 = vpop.f32.mrf.mxu0  ;;  %1216 = vmatmul.mubr.msk.f32.vlgmr.msra.gmra.mxu1 %vm530_vm2, %v729_v19 }
 0x1a7   : > { %v730_v24 = vmax.f32 %v660_v22, 0.0  ;;  %v675_v26 = vadd.f32 %v1193_v23, %v1048_v12 }
 0x1a8   : > { %v669_v27 = vpop.f32.mrf.mxu0 }
 0x1a9   : > { %v670_v28 = vadd.f32 %v1048_v12, %v669_v27  ;;  %1218 = vmatprep.mubr.msk.f32.mxu1 %vm530_vm2, %v730_v24  ;;  %v733_v31 = vmax.f32 %v675_v26, 0.0 }
 0x1aa   : > { %v1196_v29 = vpop.f32.mrf.mxu1  ;;  %1219 = vmatmul.mubr.msk.f32.gmra.mxu1 %vm530_vm2, %v731_v25 }
 0x1ab   : > { %v732_v30 = vmax.f32 %v670_v28, 0.0  ;;  %v685_v32 = vadd.f32 %v1196_v29, %v1048_v12 }
 0x1ac   : > { %v679_v33 = vpop.f32.mrf.mxu1 }
 0x1ad   : > { %v680_v34 = vadd.f32 %v1048_v12, %v679_v33  ;;  %1221 = vmatprep.mubr.msk.f32.mxu1 %vm530_vm2, %v732_v30  ;;  %v735_v37 = vmax.f32 %v685_v32, 0.0 }
 0x1ae   : > { %v1199_v35 = vpop.f32.mrf.mxu1  ;;  %1222 = vmatmul.mubr.msk.f32.gmra.mxu1 %vm530_vm2, %v733_v31 }
 0x1af   : > { %v734_v36 = vmax.f32 %v680_v34, 0.0  ;;  %v695_v38 = vadd.f32 %v1199_v35, %v1048_v12 }
 0x1b0   : > { %v689_v39 = vpop.f32.mrf.mxu1 }
 0x1b1   : > { %v690_v40 = vadd.f32 %v1048_v12, %v689_v39  ;;  %1224 = vmatprep.mubr.msk.f32.mxu1 %vm530_vm2, %v734_v36  ;;  %v737_v43 = vmax.f32 %v695_v38, 0.0 }
 0x1b2   : > { %v1202_v41 = vpop.f32.mrf.mxu1  ;;  %1225 = vmatmul.mubr.msk.f32.gmra.mxu1 %vm530_vm2, %v735_v37 }
 0x1b3   : > { %v736_v42 = vmax.f32 %v690_v40, 0.0  ;;  %v705_v44 = vadd.f32 %v1202_v41, %v1048_v12 }
 0x1b4   : > { %v699_v45 = vpop.f32.mrf.mxu1 }
 0x1b5   : > { %v700_v46 = vadd.f32 %v1048_v12, %v699_v45  ;;  %1227 = vmatprep.mubr.msk.f32.mxu1 %vm530_vm2, %v736_v42  ;;  %v739_v49 = vmax.f32 %v705_v44, 0.0 }
 0x1b6   : > { %v1205_v47 = vpop.f32.mrf.mxu1  ;;  %1228 = vmatmul.mubr.msk.f32.gmra.mxu1 %vm530_vm2, %v737_v43 }
 0x1b7   : > { %v738_v48 = vmax.f32 %v700_v46, 0.0  ;;  %v715_v50 = vadd.f32 %v1205_v47, %v1048_v12 }
 0x1b8   : > { %v709_v51 = vpop.f32.mrf.mxu1 }
 0x1b9   : > { %v710_v52 = vadd.f32 %v1048_v12, %v709_v51  ;;  %1230 = vmatprep.mubr.msk.f32.mxu1 %vm530_vm2, %v738_v48  ;;  %v741_v55 = vmax.f32 %v715_v50, 0.0 }
 0x1ba   : > { %v1208_v53 = vpop.f32.mrf.mxu1  ;;  %1231 = vmatmul.mubr.msk.f32.gmra.mxu1 %vm530_vm2, %v739_v49 }
 0x1bb   : > { %v740_v54 = vmax.f32 %v710_v52, 0.0  ;;  %v725_v56 = vadd.f32 %v1208_v53, %v1048_v12 }
 0x1bc   : > { %v719_v57 = vpop.f32.mrf.mxu1 }
 0x1bd   : > { %v720_v58 = vadd.f32 %v1048_v12, %v719_v57  ;;  %1233 = vmatprep.mubr.msk.f32.mxu1 %vm530_vm2, %v740_v54  ;;  %v743_v60 = vmax.f32 %v725_v56, 0.0 }
 0x1be   : > { %1234 = vmatmul.mubr.msk.f32.gmra.mxu1 %vm530_vm2, %v741_v55 }
 0x1bf   : > { %v742_v59 = vmax.f32 %v720_v58, 0.0 }
 0x1c1   : > { %1236 = vmatprep.mubr.msk.f32.mxu1 %vm530_vm2, %v742_v59 }
 0x1c2   : > { %1237 = vmatmul.mubr.msk.f32.gmra.mxu1 %vm530_vm2, %v743_v60 }
 0x266   : > { %v1217_v62 = vpop.f32.mrf.mxu1 }
 0x267   : > { %v877_v63 = vadd.f32 %v1217_v62, %v1066_v61 }
 0x268   : > { %v871_v0 = vpop.f32.mrf.mxu1 }
 0x269   : > { %951 = vst.msk [vmem:[%s1454_s18 + $0x8] sm:$0xff] %vm310_vm1, %v877_v63  ;;  %v872_v1 = vadd.f32 %v1066_v61, %v871_v0 }
 0x26a   : > { %v1220_v2 = vpop.f32.mrf.mxu1 }
 0x26b   : > { %950 = vst.msk [vmem:[%s1454_s18] sm:$0xff] %vm310_vm1, %v872_v1  ;;  %v887_v3 = vadd.f32 %v1220_v2, %v1066_v61 }
 0x26c   : > { %v881_v4 = vpop.f32.mrf.mxu1 }
 0x26d   : > { %953 = vst.msk [vmem:[%s1454_s18 + $0x18] sm:$0xff] %vm310_vm1, %v887_v3  ;;  %v882_v5 = vadd.f32 %v1066_v61, %v881_v4 }
 0x26e   : > { %v1223_v6 = vpop.f32.mrf.mxu1 }
 0x26f   : > { %952 = vst.msk [vmem:[%s1454_s18 + $0x10] sm:$0xff] %vm310_vm1, %v882_v5  ;;  %v897_v7 = vadd.f32 %v1223_v6, %v1066_v61 }
 0x270   : > { %v891_v8 = vpop.f32.mrf.mxu1 }
 0x271   : > { %955 = vst.msk [vmem:[%s1454_s18 + $0x28] sm:$0xff] %vm310_vm1, %v897_v7  ;;  %v892_v9 = vadd.f32 %v1066_v61, %v891_v8 }
 0x272   : > { %v1226_v10 = vpop.f32.mrf.mxu1 }
 0x273   : > { %954 = vst.msk [vmem:[%s1454_s18 + $0x20] sm:$0xff] %vm310_vm1, %v892_v9  ;;  %v907_v11 = vadd.f32 %v1226_v10, %v1066_v61 }
 0x274   : > { %v901_v12 = vpop.f32.mrf.mxu1 }
 0x275   : > { %957 = vst.msk [vmem:[%s1454_s18 + $0x38] sm:$0xff] %vm310_vm1, %v907_v11  ;;  %v902_v13 = vadd.f32 %v1066_v61, %v901_v12 }
 0x276   : > { %v1229_v14 = vpop.f32.mrf.mxu1 }
 0x277   : > { %956 = vst.msk [vmem:[%s1454_s18 + $0x30] sm:$0xff] %vm310_vm1, %v902_v13  ;;  %v917_v15 = vadd.f32 %v1229_v14, %v1066_v61 }
 0x278   : > { %v911_v16 = vpop.f32.mrf.mxu1 }
 0x279   : > { %959 = vst.msk [vmem:[%s1454_s18 + $0x48] sm:$0xff] %vm310_vm1, %v917_v15  ;;  %v912_v17 = vadd.f32 %v1066_v61, %v911_v16 }
 0x27a   : > { %v1232_v18 = vpop.f32.mrf.mxu1 }
 0x27b   : > { %958 = vst.msk [vmem:[%s1454_s18 + $0x40] sm:$0xff] %vm310_vm1, %v912_v17  ;;  %v927_v19 = vadd.f32 %v1232_v18, %v1066_v61 }
 0x27c   : > { %v921_v20 = vpop.f32.mrf.mxu1 }
 0x27d   : > { %961 = vst.msk [vmem:[%s1454_s18 + $0x58] sm:$0xff] %vm310_vm1, %v927_v19  ;;  %v922_v21 = vadd.f32 %v1066_v61, %v921_v20 }
 0x27e   : > { %v1235_v22 = vpop.f32.mrf.mxu1 }
 0x27f   : > { %960 = vst.msk [vmem:[%s1454_s18 + $0x50] sm:$0xff] %vm310_vm1, %v922_v21  ;;  %v937_v23 = vadd.f32 %v1235_v22, %v1066_v61 }
 0x280   : > { %v931_v24 = vpop.f32.mrf.mxu1 }
 0x281   : > { %963 = vst.msk [vmem:[%s1454_s18 + $0x68] sm:$0xff] %vm310_vm1, %v937_v23  ;;  %v932_v25 = vadd.f32 %v1066_v61, %v931_v24 }
 0x282   : > { %v1238_v26 = vpop.f32.mrf.mxu1 }
 0x283   : > { %962 = vst.msk [vmem:[%s1454_s18 + $0x60] sm:$0xff] %vm310_vm1, %v932_v25  ;;  %v947_v27 = vadd.f32 %v1238_v26, %v1066_v61 }
 0x284   : > { %v941_v28 = vpop.f32.mrf.mxu1 }
 0x285   : > { %965 = vst.msk [vmem:[%s1454_s18 + $0x78] sm:$0xff] %vm310_vm1, %v947_v27  ;;  %v942_v29 = vadd.f32 %v1066_v61, %v941_v28 }
 0x287   : > { %964 = vst.msk [vmem:[%s1454_s18 + $0x70] sm:$0xff] %vm310_vm1, %v942_v29 }
 0x288 PF: > { %s17_s24 = sadd.s32 1, %s1259_s24  }
 0x289   : > { %p14_p4 = scmp.ge.s32.totalorder %s17_s24, 4  }
 0x28b   :  { %16 = sbr.rel (!%p14_p4) target bundleno = 1 (0x1), region = 78 }

</bundles_post_ra>
